<compile_context>
chip_gen: v7x
topology: tpu7x:2x2x1
jax: 0.10.0
libtpu: 0.0.40
codegen_flags: <defaults>
</compile_context>

<pallas_src>
import jax
import jax.numpy as jnp
from jax.experimental import pallas as pl
from jax.experimental.pallas import tpu as pltpu


def _round_up(x, m):
    return (x + m - 1) // m * m


def _gelu_tanh(x):
    # GELU(approximate='tanh'):
    # 0.5 * x * (1 + tanh(sqrt(2/pi) * (x + 0.044715 * x^3)))
    c = 0.7978845608028654  # sqrt(2/pi)
    return 0.5 * x * (1.0 + jnp.tanh(c * (x + 0.044715 * x * x * x)))


def ffn_kernel(x_ref, wgu_ref, wd_ref, o_ref, acc_ref):
    # x_ref:   (tm, dim)        token tile (native dtype)
    # wgu_ref: (dim, 2*th)      packed [gate | up] weight tile (native dtype)
    # wd_ref:  (th, dim)        down_proj weight tile (native dtype, pre-transposed)
    # o_ref:   (tm, dim)        output tile
    # acc_ref: (tm, dim) f32    VMEM accumulator over hidden tiles
    h_idx = pl.program_id(1)

    @pl.when(h_idx == 0)
    def _():
        acc_ref[...] = jnp.zeros_like(acc_ref)

    x = x_ref[...]
    wgu = wgu_ref[...]
    # One fused MXU matmul for gate+up, f32 accumulation.
    gu = jnp.dot(x, wgu, preferred_element_type=jnp.float32)  # (tm, 2*th)
    th = wgu.shape[-1] // 2
    g = gu[:, :th]
    u = gu[:, th:]
    h = (_gelu_tanh(g) * u).astype(wd_ref.dtype)
    acc_ref[...] += jnp.dot(h, wd_ref[...], preferred_element_type=jnp.float32)

    @pl.when(h_idx == pl.num_programs(1) - 1)
    def _():
        o_ref[...] = acc_ref[...].astype(o_ref.dtype)


def feed_forward(x, wg, wu, wd, *, tm_max=256, th_max=512):
    """x: [..., dim]; wg/wu: [hidden, dim]; wd: [dim, hidden] (PyTorch layout)."""
    orig_shape = x.shape
    dim = orig_shape[-1]
    hidden = wg.shape[0]
    x2 = x.reshape(-1, dim)
    M = x2.shape[0]

    # --- token tiling (pad, don't assert) ---
    if M <= tm_max:
        tm = max(8, _round_up(M, 8))
        m_pad = tm
    else:
        tm = tm_max
        m_pad = _round_up(M, tm)
    if m_pad != M:
        x2 = jnp.pad(x2, ((0, m_pad - M), (0, 0)))

    # --- hidden tiling (128-aligned, pad weights with zeros: contributes 0) ---
    if hidden <= th_max:
        th = _round_up(hidden, 128)
        h_pad = th
    else:
        th = th_max
        h_pad = _round_up(hidden, th)
    nh = h_pad // th

    # --- one-time weight layout prep (ideally hoisted/cached by the caller) ---
    wgt = wg.T  # [dim, hidden]
    wut = wu.T  # [dim, hidden]
    wdt = wd.T  # [hidden, dim]
    if h_pad != hidden:
        wgt = jnp.pad(wgt, ((0, 0), (0, h_pad - hidden)))
        wut = jnp.pad(wut, ((0, 0), (0, h_pad - hidden)))
        wdt = jnp.pad(wdt, ((0, h_pad - hidden), (0, 0)))
    # Pack gate/up per hidden block: wgu[h] = [Wg.T[:, h-block] | Wu.T[:, h-block]]
    wg_b = wgt.reshape(dim, nh, th).transpose(1, 0, 2)   # [nh, dim, th]
    wu_b = wut.reshape(dim, nh, th).transpose(1, 0, 2)   # [nh, dim, th]
    wgu = jnp.concatenate([wg_b, wu_b], axis=2)          # [nh, dim, 2*th]

    # --- VMEM budget: double-buffered tiles + f32 accumulator + headroom ---
    w_item = jnp.dtype(wg.dtype).itemsize
    x_item = jnp.dtype(x.dtype).itemsize
    per_step = (tm * dim * x_item            # x tile
                + dim * 2 * th * w_item      # packed gate/up tile
                + th * dim * w_item          # down tile
                + tm * dim * x_item)         # out tile
    vmem_bytes = 2 * per_step + tm * dim * 4 + (2 << 20)
    vmem_bytes = int(max(32 << 20, min(96 << 20, vmem_bytes)))

    cost = pl.CostEstimate(
        flops=6 * m_pad * dim * h_pad,
        transcendentals=m_pad * h_pad,
        bytes_accessed=(x2.size * x_item + wgu.size * w_item
                        + wdt.size * w_item + m_pad * dim * x_item),
    )

    out = pl.pallas_call(
        ffn_kernel,
        out_shape=jax.ShapeDtypeStruct((m_pad, dim), x.dtype),
        grid_spec=pltpu.PrefetchScalarGridSpec(
            num_scalar_prefetch=0,
            grid=(m_pad // tm, nh),
            in_specs=[
                pl.BlockSpec((tm, dim), lambda i, h: (i, 0)),               # x tile
                pl.BlockSpec((None, dim, 2 * th), lambda i, h: (h, 0, 0)),  # packed gate|up
                pl.BlockSpec((th, dim), lambda i, h: (h, 0)),               # down tile
            ],
            out_specs=pl.BlockSpec((tm, dim), lambda i, h: (i, 0)),
            scratch_shapes=[pltpu.VMEM((tm, dim), jnp.float32)],
        ),
        compiler_params=pltpu.CompilerParams(
            dimension_semantics=("parallel", "arbitrary"),
            vmem_limit_bytes=vmem_bytes,
        ),
        cost_estimate=cost,
    )(x2, wgu, wdt)

    return out[:M].reshape(orig_shape)


def feed_forward_ref(x, wg, wu, wd):
    g = x @ wg.T
    u = x @ wu.T
    return (_gelu_tanh(g) * u) @ wd.T


def _make_params(key, dim, hidden_dim, dtype=jnp.float32):
    kg, ku, kd = jax.random.split(key, 3)
    wg = jax.random.uniform(kg, (hidden_dim, dim), dtype,
                            -1.0 / dim ** 0.5, 1.0 / dim ** 0.5)
    wu = jax.random.uniform(ku, (hidden_dim, dim), dtype,
                            -1.0 / dim ** 0.5, 1.0 / dim ** 0.5)
    wd = jax.random.uniform(kd, (dim, hidden_dim), dtype,
                            -1.0 / hidden_dim ** 0.5, 1.0 / hidden_dim ** 0.5)
    return wg, wu, wd


if __name__ == "__main__":
    key = jax.random.PRNGKey(0)

    # Test 1: small shapes consistent with the module (dim=32, hidden=64, B=2, S=8).
    B, S, dim, hidden_dim = 2, 8, 32, 64
    k1, k2, key = jax.random.split(key, 3)
    x = jax.random.normal(k1, (B, S, dim), dtype=jnp.float32)
    wg, wu, wd = _make_params(k2, dim, hidden_dim)
    out = jax.block_until_ready(feed_forward(x, wg, wu, wd))
    ref = feed_forward_ref(x, wg, wu, wd)
    assert out.shape == x.shape
    assert jnp.allclose(out, ref, atol=2e-5, rtol=2e-5), "mismatch vs reference (test 1)"

    # Test 2: exercises hidden-dim tiling (nh=3), hidden padding and token padding.
    B2, S2, dim2, hidden2 = 2, 20, 128, 1152
    k3, k4 = jax.random.split(key, 2)
    x2 = jax.random.normal(k3, (B2, S2, dim2), dtype=jnp.float32)
    wg2, wu2, wd2 = _make_params(k4, dim2, hidden2)
    out2 = jax.block_until_ready(feed_forward(x2, wg2, wu2, wd2))
    ref2 = feed_forward_ref(x2, wg2, wu2, wd2)
    assert out2.shape == x2.shape
    assert jnp.allclose(out2, ref2, atol=5e-5, rtol=5e-5), "mismatch vs reference (test 2)"

    print("KERNEL_OK")
</pallas_src>

<mosaic_0001>
module attributes {stable_mosaic.version = 11 : i64} {
  func.func @ffn_kernel(%arg0: i32, %arg1: i32, %arg2: memref<16x32xf32, #tpu.memory_space<vmem>>, %arg3: memref<1x32x256xf32, #tpu.memory_space<vmem>>, %arg4: memref<128x32xf32, #tpu.memory_space<vmem>>, %arg5: memref<16x32xf32, #tpu.memory_space<vmem>>, %arg6: memref<16x32xf32, #tpu.memory_space<vmem>>) attributes {dimension_semantics = [#tpu.dimension_semantics<parallel>, #tpu.dimension_semantics<arbitrary>], iteration_bounds = array<i64: 1, 1>, scalar_prefetch = 0 : i64, scratch_operands = 1 : i64, tpu.core_type = #tpu.core_type<tc>, window_params = [{transform_indices = @transform_0, window_bounds = array<i64: 16, 32>}, {transform_indices = @transform_1, window_bounds = array<i64: 1, 32, 256>}, {transform_indices = @transform_2, window_bounds = array<i64: 128, 32>}, {transform_indices = @transform_3, window_bounds = array<i64: 16, 32>}]} {
    %c0_i32 = arith.constant 0 : i32
    %0 = arith.cmpi eq, %arg1, %c0_i32 : i32
    %1 = arith.extui %0 : i1 to i32
    %c0_i32_0 = arith.constant 0 : i32
    %2 = arith.cmpi ne, %1, %c0_i32_0 : i32
    scf.if %2 {
      %cst_18 = arith.constant 0.000000e+00 : f32
      %31 = vector.broadcast %cst_18 : f32 to vector<16x32xf32>
      %c0_19 = arith.constant 0 : index
      %c0_20 = arith.constant 0 : index
      %32 = vector.load %arg6[%c0_19, %c0_20] : memref<16x32xf32, #tpu.memory_space<vmem>>, vector<16x32xf32>
      tpu.vector_store %arg6[%c0_19, %c0_20], %31 {strides = array<i32>} : memref<16x32xf32, #tpu.memory_space<vmem>>, vector<16x32xf32>,
    } else {
    }
    %c0 = arith.constant 0 : index
    %c0_1 = arith.constant 0 : index
    %3 = vector.load %arg2[%c0, %c0_1] : memref<16x32xf32, #tpu.memory_space<vmem>>, vector<16x32xf32>
    %c0_2 = arith.constant 0 : index
    %c0_3 = arith.constant 0 : index
    %c0_4 = arith.constant 0 : index
    %4 = vector.load %arg3[%c0_2, %c0_3, %c0_4] : memref<1x32x256xf32, #tpu.memory_space<vmem>>, vector<1x32x256xf32>
    %5 = vector.shape_cast %4 : vector<1x32x256xf32> to vector<32x256xf32>
    %cst = arith.constant dense<0.000000e+00> : vector<16x256xf32>
    %6 = tpu.matmul %3, %5, %cst {dimension_numbers = #tpu.dot_dimension_numbers<[1], [0], [0], [1], [0, 0, 1, 1], [], []>} : vector<16x32xf32>, vector<32x256xf32>, vector<16x256xf32> -> vector<16x256xf32>
    %7 = vector.extract_strided_slice %6 {offsets = [0, 0], sizes = [16, 128], strides = [1, 1]} : vector<16x256xf32> to vector<16x128xf32>
    %8 = vector.extract_strided_slice %6 {offsets = [0, 128], sizes = [16, 128], strides = [1, 1]} : vector<16x256xf32> to vector<16x128xf32>
    %cst_5 = arith.constant 5.000000e-01 : f32
    %9 = vector.broadcast %cst_5 : f32 to vector<16x128xf32>
    %10 = arith.mulf %9, %7 : vector<16x128xf32>
    %cst_6 = arith.constant 4.471500e-02 : f32
    %11 = vector.broadcast %cst_6 : f32 to vector<16x128xf32>
    %12 = arith.mulf %11, %7 : vector<16x128xf32>
    %13 = arith.mulf %12, %7 : vector<16x128xf32>
    %14 = arith.mulf %13, %7 : vector<16x128xf32>
    %15 = arith.addf %7, %14 : vector<16x128xf32>
    %cst_7 = arith.constant 0.797884583 : f32
    %16 = vector.broadcast %cst_7 : f32 to vector<16x128xf32>
    %17 = arith.mulf %16, %15 : vector<16x128xf32>
    %18 = math.tanh %17 : vector<16x128xf32>
    %cst_8 = arith.constant 1.000000e+00 : f32
    %19 = vector.broadcast %cst_8 : f32 to vector<16x128xf32>
    %20 = arith.addf %19, %18 : vector<16x128xf32>
    %21 = arith.mulf %10, %20 : vector<16x128xf32>
    %22 = arith.mulf %21, %8 : vector<16x128xf32>
    %c0_9 = arith.constant 0 : index
    %c0_10 = arith.constant 0 : index
    %23 = vector.load %arg6[%c0_9, %c0_10] : memref<16x32xf32, #tpu.memory_space<vmem>>, vector<16x32xf32>
    %c0_11 = arith.constant 0 : index
    %c0_12 = arith.constant 0 : index
    %24 = vector.load %arg4[%c0_11, %c0_12] : memref<128x32xf32, #tpu.memory_space<vmem>>, vector<128x32xf32>
    %cst_13 = arith.constant dense<0.000000e+00> : vector<16x32xf32>
    %25 = tpu.matmul %22, %24, %cst_13 {dimension_numbers = #tpu.dot_dimension_numbers<[1], [0], [0], [1], [0, 0, 1, 1], [], []>} : vector<16x128xf32>, vector<128x32xf32>, vector<16x32xf32> -> vector<16x32xf32>
    %26 = arith.addf %23, %25 : vector<16x32xf32>
    %c0_14 = arith.constant 0 : index
    %c0_15 = arith.constant 0 : index
    %27 = vector.load %arg6[%c0_14, %c0_15] : memref<16x32xf32, #tpu.memory_space<vmem>>, vector<16x32xf32>
    tpu.vector_store %arg6[%c0_14, %c0_15], %26 {strides = array<i32>} : memref<16x32xf32, #tpu.memory_space<vmem>>, vector<16x32xf32>,
    %c0_i32_16 = arith.constant 0 : i32
    %28 = arith.cmpi eq, %arg1, %c0_i32_16 : i32
    %29 = arith.extui %28 : i1 to i32
    %c0_i32_17 = arith.constant 0 : i32
    %30 = arith.cmpi ne, %29, %c0_i32_17 : i32
    scf.if %30 {
      %c0_18 = arith.constant 0 : index
      %c0_19 = arith.constant 0 : index
      %31 = vector.load %arg6[%c0_18, %c0_19] : memref<16x32xf32, #tpu.memory_space<vmem>>, vector<16x32xf32>
      %c0_20 = arith.constant 0 : index
      %c0_21 = arith.constant 0 : index
      %32 = vector.load %arg5[%c0_20, %c0_21] : memref<16x32xf32, #tpu.memory_space<vmem>>, vector<16x32xf32>
      tpu.vector_store %arg5[%c0_20, %c0_21], %31 {strides = array<i32>} : memref<16x32xf32, #tpu.memory_space<vmem>>, vector<16x32xf32>,
    } else {
    }
    return
  }
  func.func @transform_0(%arg0: i32, %arg1: i32) -> (i32, i32) {
    %c0_i32 = arith.constant 0 : i32
    %c0_i32_0 = arith.constant 0 : i32
    return %arg0, %c0_i32 : i32, i32
  }
  func.func @transform_1(%arg0: i32, %arg1: i32) -> (i32, i32, i32) {
    %c0_i32 = arith.constant 0 : i32
    %c0_i32_0 = arith.constant 0 : i32
    %c0_i32_1 = arith.constant 0 : i32
    return %arg1, %c0_i32, %c0_i32_0 : i32, i32, i32
  }
  func.func @transform_2(%arg0: i32, %arg1: i32) -> (i32, i32) {
    %c0_i32 = arith.constant 0 : i32
    %c0_i32_0 = arith.constant 0 : i32
    return %arg1, %c0_i32 : i32, i32
  }
  func.func @transform_3(%arg0: i32, %arg1: i32) -> (i32, i32) {
    %c0_i32 = arith.constant 0 : i32
    %c0_i32_0 = arith.constant 0 : i32
    return %arg0, %c0_i32 : i32, i32
  }
}

</mosaic_0001>

<bundles_post_ra>
// kernel: tpu_custom_call.1
= control target key start
LH: loop header
LB: loop body
LE: loop exit
PB: predicated region body
PF: predicated region fallthrough
CT: control target
= control target key end

     0   :  { %vm19_vm0 = vcmask 261120   ;;  %v383_v7 = vmov 0.0   ;;  %s505_s0 = inlined_call_operand.vmem [shape: f32[16,32], index: 0, kind: input, shape index: {}]   ;;  %s506_s1 = inlined_call_operand.vmem [shape: f32[1,32,256], index: 1, kind: input, shape index: {}]   ;;  %s507_s2 = inlined_call_operand.vmem [shape: f32[128,32], index: 2, kind: input, shape index: {}]   ;;  %s508_s3 = inlined_call_operand.hbm [shape: f32[16,32], index: 3, kind: output, shape index: {}]  }
   0x1   :  { %v25_v0 = vld [vmem:[%s506_s1 + $0x8] sm:$0xff]  ;;  %v27_v1 = vld [vmem:[%s506_s1 + $0x18] sm:$0xff]  ;;  %v24_v2 = vld [vmem:[%s506_s1] sm:$0xff]  ;;  %20 = vst.msk [vmem:[#allocation2] sm:$0xff] %vm19_vm0, %v383_v7  ;;  %103 = vmatprep.mubr.f32.mxu0 %v383_v7 }
   0x2   :  { %v311_v3 = vpack.c.bf16 %v27_v1, %v25_v0  ;;  %v26_v4 = vld [vmem:[%s506_s1 + $0x10] sm:$0xff]  ;;  %v29_v5 = vld [vmem:[%s506_s1 + $0x28] sm:$0xff]  ;;  %v31_v6 = vld [vmem:[%s506_s1 + $0x38] sm:$0xff]  ;;  %21 = vst.msk [vmem:[#allocation2 + $0x8] sm:$0xff] %vm19_vm0, %v383_v7 }
   0x3   :  { %v313_v8 = vpack.c.bf16 %v26_v4, %v24_v2  ;;  %v315_v9 = vpack.c.bf16 %v31_v6, %v29_v5  ;;  %v28_v10 = vld [vmem:[%s506_s1 + $0x20] sm:$0xff]  ;;  %v30_v11 = vld [vmem:[%s506_s1 + $0x30] sm:$0xff] }
   0x4   :  { %312 = vmatprep.subr.bf16.mxu0 %v311_v3 }
   0x5   :  { %8 = vsyncpa [#allocation4], 0  ;;  %314 = vmatpush1.bf16.msra.mxu0 %v313_v8  ;;  %v317_v12 = vpack.c.bf16 %v30_v11, %v28_v10  ;;  %v22_v13 = vld [vmem:[%s505_s0] sm:$0xff]  ;;  %v23_v14 = vld [vmem:[%s505_s0 + $0x8] sm:$0xff] }
   0x6   :  { %316 = vmatprep.subr.bf16.mxu0 %v315_v9  ;;  %v138_v15 = vld [vmem:[%s507_s2] sm:$0xff]  ;;  %v139_v16 = vld [vmem:[%s507_s2 + $0x8] sm:$0xff]  ;;  %v140_v18 = vld [vmem:[%s507_s2 + $0x10] sm:$0xff] }
   0x7   :  { %v319_v17 = vpack.c.bf16 %v139_v16, %v138_v15  ;;  %v141_v19 = vld [vmem:[%s507_s2 + $0x18] sm:$0xff]  ;;  %v142_v21 = vld [vmem:[%s507_s2 + $0x20] sm:$0xff]  ;;  %v143_v22 = vld [vmem:[%s507_s2 + $0x28] sm:$0xff] }
   0x8   :  { %v323_v20 = vpack.c.bf16 %v141_v19, %v140_v18  ;;  %v327_v23 = vpack.c.bf16 %v143_v22, %v142_v21  ;;  %v144_v24 = vld [vmem:[%s507_s2 + $0x30] sm:$0xff]  ;;  %v145_v25 = vld [vmem:[%s507_s2 + $0x38] sm:$0xff]  ;;  %v146_v27 = vld [vmem:[%s507_s2 + $0x40] sm:$0xff] }
   0x9   :  { %318 = vmatpush1.bf16.msra.mxu0 %v317_v12  ;;  %320 = vmatprep.subr.bf16.mxu1 %v319_v17  ;;  %v331_v26 = vpack.c.bf16 %v145_v25, %v144_v24  ;;  %v147_v28 = vld [vmem:[%s507_s2 + $0x48] sm:$0xff]  ;;  %v148_v30 = vld [vmem:[%s507_s2 + $0x50] sm:$0xff]  ;;  %v149_v31 = vld [vmem:[%s507_s2 + $0x58] sm:$0xff] }
   0xa   :  { %322 = vmatpush3.bf16.msra.mxu1 %v319_v17  ;;  %v335_v29 = vpack.c.bf16 %v147_v28, %v146_v27  ;;  %v339_v32 = vpack.c.bf16 %v149_v31, %v148_v30  ;;  %v150_v33 = vld [vmem:[%s507_s2 + $0x60] sm:$0xff]  ;;  %v151_v34 = vld [vmem:[%s507_s2 + $0x68] sm:$0xff]  ;;  %v152_v36 = vld [vmem:[%s507_s2 + $0x70] sm:$0xff] }
   0xb   :  { %324 = vmatprep.subr.bf16.mxu1 %v323_v20  ;;  %v343_v35 = vpack.c.bf16 %v151_v34, %v150_v33  ;;  %v153_v37 = vld [vmem:[%s507_s2 + $0x78] sm:$0xff]  ;;  %v137_v63 = vld [vmem:[#allocation2 + $0x8] sm:$0xff]  ;;  %v136_v0 = vld [vmem:[#allocation2] sm:$0xff]  ;;  %s384_s2 = smov [#allocation3]  }
   0xc   :  { %256 = vmatmul.mubr.msk.f32.vlgmr.msra.gmra.mrb[0].mxu0 %vm19_vm0, %v22_v13  ;;  %v347_v38 = vpack.c.bf16 %v153_v37, %v152_v36  ;;  %s245_s7 = sshll.u32 %s384_s2, 4  ;;  %s246_s7 = int_to_ptr.vmem [resolvable:$true] %s245_s7 }
   0xd   :  { %109 = vmatprep.mubr.f32.mxu0 %v383_v7  ;;  %s359_s8 = scalar_lea.vmem %s246_s7, 256  ;;  %p364_p1 = scmp.lt.s32.totalorder %s246_s7, %s246_s7 }
   0xe   :  { %326 = vmatpush3.bf16.msra.mxu1 %v323_v20  ;;  %p360_p0 = scmp.ne.s32.totalorder %s246_s7, %s359_s8  ;;  %p365_p2 = scmp.lt.s32.totalorder %s359_s8, %s359_s8 }
   0xf   :  { %328 = vmatprep.subr.bf16.mxu1 %v327_v23 }
  0x10   :  { %257 = vmatmul.mubr.msk.f32.gmra.mrb[2].mxu0 %vm19_vm0, %v23_v14  ;;  %p366_p3 = por %p365_p2, %p364_p1 }
  0x12   :  { %330 = vmatpush3.bf16.msra.mxu1 %v327_v23  ;;  %p367_p4 = pnand %p366_p3, %p360_p0 }
  0x13   :  { %332 = vmatprep.subr.bf16.mxu1 %v331_v26 }
  0x16   :  { %334 = vmatpush3.bf16.msra.mxu1 %v331_v26 }
  0x17   :  { %336 = vmatprep.subr.bf16.mxu1 %v335_v29 }
  0x1a   :  { %338 = vmatpush3.bf16.msra.mxu1 %v335_v29 }
  0x1b   :  { %340 = vmatprep.subr.bf16.mxu1 %v339_v32 }
  0x1e   :  { %342 = vmatpush3.bf16.msra.mxu1 %v339_v32 }
  0x1f   :  { %344 = vmatprep.subr.bf16.mxu1 %v343_v35 }
  0x22   :  { %346 = vmatpush3.bf16.msra.mxu1 %v343_v35 }
  0x23   :  { %348 = vmatprep.subr.bf16.mxu1 %v347_v38 }
  0x26   :  { %350 = vmatpush3.bf16.msra.mxu1 %v347_v38 }
  0xdf   :  { %v105_v39 = vpop.f32.mrb[0].mxu0 }
  0xe0   :  { %v118_v40 = vmul.f32 0.044715, %v105_v39  ;;  %v107_v41 = vpop.f32.mrb[1].mxu0  ;;  %v116_v54 = vmul.f32 0.5, %v105_v39 }
  0xe2   :  { %v120_v42 = vmul.f32 %v118_v40, %v105_v39 }
  0xe3   :  { %v111_v43 = vpop.f32.mrb[2].mxu0 }
  0xe4   :  { %v122_v44 = vmul.f32 %v120_v42, %v105_v39  ;;  %v119_v45 = vmul.f32 0.044715, %v111_v43  ;;  %v113_v46 = vpop.f32.mrb[3].mxu0  ;;  %v117_v58 = vmul.f32 0.5, %v111_v43 }
  0xe6   :  { %v121_v47 = vmul.f32 %v119_v45, %v111_v43  ;;  %v124_v48 = vadd.f32 %v122_v44, %v105_v39 }
  0xe8   :  { %v123_v49 = vmul.f32 %v121_v47, %v111_v43  ;;  %v126_v50 = vmul.f32 0.7978846, %v124_v48 }
  0xea   :  { %v125_v51 = vadd.f32 %v123_v49, %v111_v43  ;;  %355 = vtanh.f32 %v126_v50 }
  0xec   :  { %v127_v52 = vmul.f32 0.7978846, %v125_v51 }
  0xee   :  { %357 = vtanh.f32 %v127_v52 }
  0xf4   :  { %v356_v53 = vpop.eup %355 }
  0xf5   :  { %v130_v55 = vadd.f32 1.0, %v356_v53 }
  0xf7   :  { %v132_v56 = vmul.f32 %v130_v55, %v116_v54 }
  0xf8   :  { %v358_v57 = vpop.eup %357 }
  0xf9   :  { %v131_v59 = vadd.f32 1.0, %v358_v57  ;;  %v134_v60 = vmul.f32 %v132_v56, %v107_v41 }
  0xfb   :  { %v133_v61 = vmul.f32 %v131_v59, %v117_v58  ;;  %308 = vmatprep.mubr.f32.mxu1 %v134_v60 }
  0xfd   :  { %v135_v62 = vmul.f32 %v133_v61, %v113_v46 }
  0xff   :  { %309 = vmatmul.mubr.f32.vlgmr.msra.gmra.mrb[0].mxu1 %v135_v62 }
 0x1d2   :  { %v310_v1 = vpop.f32.mrb[0].mxu1 }
 0x1d3   :  { %v230_v2 = vadd.f32 %v310_v1, %v137_v63  ;;  %v220_v3 = vpop.f32.mrb[1].mxu1 }
 0x1d4   :  { %v229_v4 = vadd.f32 %v220_v3, %v136_v0 }
 0x1d5   :  { %232 = vst.msk [vmem:[#allocation2 + $0x8] sm:$0xff] %vm19_vm0, %v230_v2 }
 0x1d6   :  { %231 = vst.msk [vmem:[#allocation2] sm:$0xff] %vm19_vm0, %v229_v4 }
 0x1dc   :  { %v237_v5 = vld [vmem:[#allocation2 + $0x8] sm:$0xff] }
 0x1dd   :  { %v236_v6 = vld [vmem:[#allocation2] sm:$0xff]  ;;  %239 = vst.msk [vmem:[#allocation3 + $0x8] sm:$0xff] %vm19_vm0, %v237_v5 }
 0x1de   :  { %238 = vst.msk [vmem:[#allocation3] sm:$0xff] %vm19_vm0, %v236_v6 }
 0x1df   :  { %370 = shalt.err (!%p367_p4)
}
 0x1e0   :  { %s371_s11 = scalar_lea.hbm %s508_s3, 256 }
 0x1e1   :  { %p372_p5 = scmp.ne.s32.totalorder %s508_s3, %s371_s11  ;;  %p375_p6 = scmp.lt.u32.totalorder %s371_s11, %s508_s3 }
 0x1e3   :  { %p377_p7 = pnand %p375_p6, %p372_p5 }
 0x1e5   :  { %380 = shalt.err (!%p377_p7)
}
 0x1e6   :  { %s385_s15 = smov 128   ;;  %s386_s16 = smov 8  }
 0x1e7   :  { %251 = dma.vmem_to_hbm [thread:$0]  %s246_s7, 256, %s508_s3, [#allocation4], %s385_s15, %s385_s15, %s386_s16  }
 0x1e8   :  { %381 = dma.done.wait [#allocation4], 256  }
 0x1e9   :  { %382 = vsyncadd [#allocation4], 4294967040 }
 0x1ea   :  { %255 = vsyncpa [#allocation4], 1 }

</bundles_post_ra>
